<compile_context>
chip_gen: v7x
topology: tpu7x:2x2x1
jax: 0.10.0
libtpu: 0.0.40
codegen_flags: <defaults>
</compile_context>

<pallas_src>
import jax
import jax.numpy as jnp
from jax.experimental import pallas as pl
from jax.experimental.pallas import tpu as pltpu


def _round_up(x, m):
    return (x + m - 1) // m * m


def _linear_kernel(x_ref, w_ref, b_ref, o_ref):
    """One (tm, tn) output tile; o_ref (f32) is the accumulator across the K axis."""
    k = pl.program_id(2)
    partial = jnp.dot(x_ref[...], w_ref[...], preferred_element_type=jnp.float32)

    @pl.when(k == 0)
    def _():
        # First K step: write dot + bias directly (no zero-fill, no extra pass).
        o_ref[...] = partial + b_ref[...]

    @pl.when(k > 0)
    def _():
        o_ref[...] += partial


def _vmem_capacity_bytes():
    try:
        return int(pltpu.get_tpu_info().vmem_capacity_bytes)
    except Exception:
        return 64 * 1024 * 1024  # conservative fallback: v7x per-TC VMEM


def make_custom_decoder(weight, bias, *, tm=256, tn=512, tk=1024,
                        compute_dtype=jnp.bfloat16):
    """Build forward(x) for torch-style nn.Linear params.

    weight : (output_dim, input_dim)   -- torch nn.Linear layout
    bias   : (output_dim,)
    Returns forward(x): (B, input_dim) -> (B, output_dim), f32.

    All weight-side layout work (transpose, pad, bf16 cast) is done here, once.
    """
    d_out, d_in = weight.shape
    in_bytes = jnp.dtype(compute_dtype).itemsize

    # ---- tile sizes (lane=128 / sublane=8 aligned) --------------------------
    tk = min(tk, _round_up(d_in, 128))
    n_aligned = _round_up(d_out, 128)
    tn = min(tn, n_aligned)
    # Megacore: if N would be a single block, split it so the parallel part of
    # the grid has >= 2 blocks even when B (hence M/tm) collapses to 1 (v7x: 2 TCs).
    if tn == n_aligned and n_aligned >= 256:
        tn = _round_up(n_aligned // 2, 128)

    vmem_cap = _vmem_capacity_bytes()
    budget = int(0.45 * vmem_cap)

    def working_set(tm_, tk_, tn_):
        return (2 * (tm_ * tk_ * in_bytes      # x tile (double-buffered)
                     + tk_ * tn_ * in_bytes    # weight tile
                     + tn_ * 4)                # bias tile (f32)
                + 2 * tm_ * tn_ * 4)           # f32 output tile

    while tk > 128 and working_set(tm, tk, tn) > budget:
        tk //= 2
    tk = max(128, _round_up(tk, 128))

    # ---- one-time parameter layout: transpose, pad, cast --------------------
    K = _round_up(d_in, tk)
    N = _round_up(d_out, tn)
    w_t = jnp.asarray(weight).T                                   # (d_in, d_out)
    w_p = jnp.pad(w_t, ((0, K - d_in), (0, N - d_out))).astype(compute_dtype)
    b_p = jnp.pad(jnp.asarray(bias), (0, N - d_out)).astype(jnp.float32)
    b_p = b_p.reshape(1, N)

    def forward(x):
        B, d_in_x = x.shape
        assert d_in_x == d_in, (d_in_x, d_in)

        tm_ = min(tm, _round_up(B, 8))
        M = _round_up(B, tm_)

        xp = x.astype(compute_dtype)
        if (M, K) != (B, d_in):
            xp = jnp.pad(xp, ((0, M - B), (0, K - d_in)))

        grid = (M // tm_, N // tn, K // tk)
        gi, gj, _ = grid

        cost = pl.CostEstimate(
            flops=2 * M * K * N,
            transcendentals=0,
            # x is re-streamed once per N block, the weight once per M block.
            bytes_accessed=(gj * M * K * in_bytes
                            + gi * K * N * in_bytes
                            + gi * N * 4
                            + M * N * 4),
        )

        vmem_limit = int(min(max(2 * working_set(tm_, tk, tn), 8 << 20),
                             int(0.7 * vmem_cap)))

        out_padded = pl.pallas_call(
            _linear_kernel,
            out_shape=jax.ShapeDtypeStruct((M, N), jnp.float32),
            grid_spec=pltpu.PrefetchScalarGridSpec(
                num_scalar_prefetch=0,
                grid=grid,
                in_specs=[
                    pl.BlockSpec((tm_, tk), lambda i, j, k: (i, k)),
                    pl.BlockSpec((tk, tn), lambda i, j, k: (k, j)),
                    pl.BlockSpec((1, tn), lambda i, j, k: (0, j)),
                ],
                out_specs=pl.BlockSpec((tm_, tn), lambda i, j, k: (i, j)),
            ),
            compiler_params=pltpu.CompilerParams(
                dimension_semantics=("parallel", "parallel", "arbitrary"),
                vmem_limit_bytes=vmem_limit,
            ),
            cost_estimate=cost,
        )(xp, w_p, b_p)

        if (M, N) != (B, d_out):
            return out_padded[:B, :d_out]
        return out_padded

    return forward


if __name__ == "__main__":
    # Small shapes consistent with the module: batch=8, input_dim=32, output_dim=64
    B, INPUT_DIM, OUTPUT_DIM = 8, 32, 64

    key = jax.random.PRNGKey(0)
    kx, kw, kb = jax.random.split(key, 3)

    x = jax.random.normal(kx, (B, INPUT_DIM), dtype=jnp.float32)

    # Parameter init mirroring nn.Linear's uniform(-1/sqrt(in), 1/sqrt(in))
    bound = 1.0 / (INPUT_DIM ** 0.5)
    weight = jax.random.uniform(
        kw, (OUTPUT_DIM, INPUT_DIM), minval=-bound, maxval=bound, dtype=jnp.float32
    )
    bias = jax.random.uniform(
        kb, (OUTPUT_DIM,), minval=-bound, maxval=bound, dtype=jnp.float32
    )

    # One-time weight layout (transpose/pad/bf16), then run the forward pass.
    decoder = make_custom_decoder(weight, bias)
    y = jax.block_until_ready(decoder(x))

    # Correctness check against plain JAX reference of the PyTorch forward.
    y_ref = x @ weight.T + bias
    assert y.shape == (B, OUTPUT_DIM)
    # bf16 MXU operands (f32 accumulation): allow bf16-level tolerance.
    assert jnp.allclose(y, y_ref, atol=2e-2, rtol=2e-2), float(
        jnp.max(jnp.abs(y - y_ref))
    )

    print("KERNEL_OK")
</pallas_src>

<mosaic_0001>
module attributes {stable_mosaic.version = 11 : i64} {
  func.func @_linear_kernel(%arg0: i32, %arg1: i32, %arg2: i32, %arg3: memref<8x128xbf16, #tpu.memory_space<vmem>>, %arg4: memref<128x128xbf16, #tpu.memory_space<vmem>>, %arg5: memref<1x128xf32, #tpu.memory_space<vmem>>, %arg6: memref<8x128xf32, #tpu.memory_space<vmem>>) attributes {dimension_semantics = [#tpu.dimension_semantics<parallel>, #tpu.dimension_semantics<parallel>, #tpu.dimension_semantics<arbitrary>], iteration_bounds = array<i64: 1, 1, 1>, scalar_prefetch = 0 : i64, scratch_operands = 0 : i64, tpu.core_type = #tpu.core_type<tc>, window_params = [{transform_indices = @transform_0, window_bounds = array<i64: 8, 128>}, {transform_indices = @transform_1, window_bounds = array<i64: 128, 128>}, {transform_indices = @transform_2, window_bounds = array<i64: 1, 128>}, {transform_indices = @transform_3, window_bounds = array<i64: 8, 128>}]} {
    %c0 = arith.constant 0 : index
    %c0_0 = arith.constant 0 : index
    %0 = vector.load %arg3[%c0, %c0_0] : memref<8x128xbf16, #tpu.memory_space<vmem>>, vector<8x128xbf16>
    %c0_1 = arith.constant 0 : index
    %c0_2 = arith.constant 0 : index
    %1 = vector.load %arg4[%c0_1, %c0_2] : memref<128x128xbf16, #tpu.memory_space<vmem>>, vector<128x128xbf16>
    %cst = arith.constant dense<0.000000e+00> : vector<8x128xf32>
    %2 = tpu.matmul %0, %1, %cst {dimension_numbers = #tpu.dot_dimension_numbers<[1], [0], [0], [1], [0, 0, 1, 1], [], []>} : vector<8x128xbf16>, vector<128x128xbf16>, vector<8x128xf32> -> vector<8x128xf32>
    %c0_i32 = arith.constant 0 : i32
    %3 = arith.cmpi eq, %arg2, %c0_i32 : i32
    %4 = arith.extui %3 : i1 to i32
    %c0_i32_3 = arith.constant 0 : i32
    %5 = arith.cmpi ne, %4, %c0_i32_3 : i32
    scf.if %5 {
      %c0_6 = arith.constant 0 : index
      %c0_7 = arith.constant 0 : index
      %9 = vector.load %arg5[%c0_6, %c0_7] : memref<1x128xf32, #tpu.memory_space<vmem>>, vector<1x128xf32>
      %10 = vector.broadcast %9 : vector<1x128xf32> to vector<8x128xf32>
      %11 = arith.addf %2, %10 : vector<8x128xf32>
      %c0_8 = arith.constant 0 : index
      %c0_9 = arith.constant 0 : index
      %12 = vector.load %arg6[%c0_8, %c0_9] : memref<8x128xf32, #tpu.memory_space<vmem>>, vector<8x128xf32>
      tpu.vector_store %arg6[%c0_8, %c0_9], %11 {strides = array<i32>} : memref<8x128xf32, #tpu.memory_space<vmem>>, vector<8x128xf32>,
    } else {
    }
    %c0_i32_4 = arith.constant 0 : i32
    %6 = arith.cmpi sgt, %arg2, %c0_i32_4 : i32
    %7 = arith.extui %6 : i1 to i32
    %c0_i32_5 = arith.constant 0 : i32
    %8 = arith.cmpi ne, %7, %c0_i32_5 : i32
    scf.if %8 {
      %c0_6 = arith.constant 0 : index
      %c0_7 = arith.constant 0 : index
      %9 = vector.load %arg6[%c0_6, %c0_7] : memref<8x128xf32, #tpu.memory_space<vmem>>, vector<8x128xf32>
      %10 = arith.addf %9, %2 : vector<8x128xf32>
      %c0_8 = arith.constant 0 : index
      %c0_9 = arith.constant 0 : index
      %11 = vector.load %arg6[%c0_8, %c0_9] : memref<8x128xf32, #tpu.memory_space<vmem>>, vector<8x128xf32>
      tpu.vector_store %arg6[%c0_8, %c0_9], %10 {strides = array<i32>} : memref<8x128xf32, #tpu.memory_space<vmem>>, vector<8x128xf32>,
    } else {
    }
    return
  }
  func.func @transform_0(%arg0: i32, %arg1: i32, %arg2: i32) -> (i32, i32) {
    %c0_i32 = arith.constant 0 : i32
    return %arg0, %arg2 : i32, i32
  }
  func.func @transform_1(%arg0: i32, %arg1: i32, %arg2: i32) -> (i32, i32) {
    %c0_i32 = arith.constant 0 : i32
    return %arg2, %arg1 : i32, i32
  }
  func.func @transform_2(%arg0: i32, %arg1: i32, %arg2: i32) -> (i32, i32) {
    %c0_i32 = arith.constant 0 : i32
    %c0_i32_0 = arith.constant 0 : i32
    return %c0_i32, %arg1 : i32, i32
  }
  func.func @transform_3(%arg0: i32, %arg1: i32, %arg2: i32) -> (i32, i32) {
    %c0_i32 = arith.constant 0 : i32
    return %arg0, %arg1 : i32, i32
  }
}

</mosaic_0001>

<bundles_post_ra>
// kernel: tpu_custom_call.1
= control target key start
LH: loop header
LB: loop body
LE: loop exit
PB: predicated region body
PF: predicated region fallthrough
CT: control target
= control target key end

     0   :  { %8 = vsyncpa [#allocation3], 0  ;;  %s381_s0 = inlined_call_operand.hbm [shape: bf16[8,128], index: 0, kind: input, shape index: {}]   ;;  %s382_s1 = inlined_call_operand.hbm [shape: bf16[128,128], index: 1, kind: input, shape index: {}]   ;;  %s383_s2 = inlined_call_operand.vmem [shape: f32[1,128], index: 2, kind: input, shape index: {}]   ;;  %s384_s3 = inlined_call_operand.hbm [shape: f32[8,128], index: 3, kind: output, shape index: {}]  }
   0x1   :  { %9 = vsyncpa [#allocation6], 0 }
   0x2   :  { %10 = vsyncpa [#allocation4], 0  ;;  %s308_s12 = smov [#allocation2]   ;;  %s309_s14 = smov [#allocation5]  }
   0x3   :  { %s17_s13 = sshll.u32 %s308_s12, 4  ;;  %s26_s15 = sshll.u32 %s309_s14, 4  ;;  %s18_s13 = int_to_ptr.vmem [resolvable:$true] %s17_s13  ;;  %s335_s15 = int_to_ptr.vmem [resolvable:$true] %s26_s15 }
   0x4   :  { %s236_s18 = scalar_lea.hbm %s381_s0, 64 }
   0x5   :  { %p237_p0 = scmp.ne.s32.totalorder %s381_s0, %s236_s18  ;;  %p240_p1 = scmp.lt.u32.totalorder %s236_s18, %s381_s0 }
   0x7   :  { %p242_p2 = pnand %p240_p1, %p237_p0 }
   0x9   :  { %245 = shalt.err (!%p242_p2)
}
   0xa   :  { %s246_s23 = scalar_lea.vmem %s18_s13, 64  ;;  %p251_p4 = scmp.lt.s32.totalorder %s18_s13, %s18_s13 }
   0xb   :  { %p247_p3 = scmp.ne.s32.totalorder %s18_s13, %s246_s23  ;;  %p252_p5 = scmp.lt.s32.totalorder %s246_s23, %s246_s23 }
   0xd   :  { %p253_p6 = por %p252_p5, %p251_p4 }
   0xf   :  { %p254_p7 = pnand %p253_p6, %p247_p3 }
  0x11   :  { %257 = shalt.err (!%p254_p7)
}
  0x12   :  { %20 = dma.hbm_to_vmem [thread:$0]  %s381_s0, 64, %s18_s13, [#allocation3]  }
  0x13   :  { %s258_s28 = scalar_lea.hbm %s382_s1, 1024 }
  0x14   :  { %p259_p8 = scmp.ne.s32.totalorder %s382_s1, %s258_s28  ;;  %p262_p9 = scmp.lt.u32.totalorder %s258_s28, %s382_s1 }
  0x16   :  { %p264_p10 = pnand %p262_p9, %p259_p8 }
  0x18   :  { %267 = shalt.err (!%p264_p10)
}
  0x19   :  { %s268_s6 = scalar_lea.vmem %s335_s15, 1024  ;;  %p273_p12 = scmp.lt.s32.totalorder %s335_s15, %s335_s15 }
  0x1a   :  { %p269_p11 = scmp.ne.s32.totalorder %s335_s15, %s268_s6  ;;  %p274_p13 = scmp.lt.s32.totalorder %s268_s6, %s268_s6 }
  0x1c   :  { %p275_p0 = por %p274_p13, %p273_p12 }
  0x1e   :  { %p276_p1 = pnand %p275_p0, %p269_p11 }
  0x20   :  { %279 = shalt.err (!%p276_p1)
}
  0x21   :  { %s310_s0 = smov 64   ;;  %s311_s7 = smov 4  }
  0x22   :  { %32 = dma.hbm_to_vmem [thread:$0]  %s382_s1, 1024, %s335_s15, [#allocation6], %s310_s0, %s310_s0, %s311_s7  }
  0x23   :  { %302 = dma.done.wait [#allocation3], 64  }
  0x24   :  { %303 = vsyncadd [#allocation3], 4294967232 }
  0x25   :  { %304 = dma.done.wait [#allocation6], 1024  }
  0x26   :  { %305 = vsyncadd [#allocation6], 4294966272  ;;  %v312_v0 = vmov 0.0   ;;  %vm313_vm0 = vmmov 0   ;;  %v228_v1 = vld [vmem:[#allocation5] sm:$0xff]   ;;  %v229_v2 = vld [vmem:[#allocation5 + $0x8] sm:$0xff]  }
  0x27   :  { %201 = vmatprep.subr.bf16.mxu0 %v312_v0  ;;  %217 = vmatprep.mubr.msk.bf16.mxu0 %vm313_vm0, %v312_v0  ;;  %v230_v3 = vld [vmem:[#allocation5 + $0x10] sm:$0xff]   ;;  %v231_v4 = vld [vmem:[#allocation5 + $0x18] sm:$0xff]   ;;  %v232_v5 = vld [vmem:[#allocation5 + $0x20] sm:$0xff]   ;;  %s314_s11 = smov [#allocation7]  }
  0x28   :  { %202 = vmatpush3.bf16.msra.mxu0 %v228_v1  ;;  %v233_v6 = vld [vmem:[#allocation5 + $0x28] sm:$0xff]   ;;  %v234_v7 = vld [vmem:[#allocation5 + $0x30] sm:$0xff]   ;;  %v235_v8 = vld [vmem:[#allocation5 + $0x38] sm:$0xff]   ;;  %s173_s12 = sshll.u32 %s314_s11, 4  ;;  %s174_s12 = int_to_ptr.vmem [resolvable:$true] %s173_s12 }
  0x29   :  { %203 = vmatprep.subr.bf16.mxu0 %v312_v0  ;;  %v42_v9 = vld [vmem:[#allocation2] sm:$0xf]  ;;  %s280_s13 = scalar_lea.vmem %s174_s12, 128  ;;  %p285_p3 = scmp.lt.s32.totalorder %s174_s12, %s174_s12 }
  0x2a   :  { %v191_v10 = vld [vmem:[%s383_s2] ss:$0 sm:$0xff]  ;;  %p281_p2 = scmp.ne.s32.totalorder %s174_s12, %s280_s13  ;;  %p286_p4 = scmp.lt.s32.totalorder %s280_s13, %s280_s13 }
  0x2c   :  { %204 = vmatpush3.bf16.msra.mxu0 %v229_v2  ;;  %p287_p5 = por %p286_p4, %p285_p3 }
  0x2d   :  { %205 = vmatprep.subr.bf16.mxu0 %v312_v0 }
  0x2e   :  { %p288_p6 = pnand %p287_p5, %p281_p2 }
  0x30   :  { %206 = vmatpush3.bf16.msra.mxu0 %v230_v3 }
  0x31   :  { %207 = vmatprep.subr.bf16.mxu0 %v312_v0 }
  0x34   :  { %208 = vmatpush3.bf16.msra.mxu0 %v231_v4 }
  0x35   :  { %209 = vmatprep.subr.bf16.mxu0 %v312_v0 }
  0x38   :  { %210 = vmatpush3.bf16.msra.mxu0 %v232_v5 }
  0x39   :  { %211 = vmatprep.subr.bf16.mxu0 %v312_v0 }
  0x3c   :  { %212 = vmatpush3.bf16.msra.mxu0 %v233_v6 }
  0x3d   :  { %213 = vmatprep.subr.bf16.mxu0 %v312_v0 }
  0x40   :  { %214 = vmatpush3.bf16.msra.mxu0 %v234_v7 }
  0x41   :  { %215 = vmatprep.subr.bf16.mxu0 %v312_v0 }
  0x44   :  { %216 = vmatpush3.bf16.msra.mxu0 %v235_v8 }
  0x47   :  { %218 = vmatmul.mubr.bf16.vlgmr.msra.gmra.mrb[0].mxu0 %v42_v9 }
 0x11a   :  { %v141_v11 = vpop.f32.mrb[0].mxu0 }
 0x11b   :  { %v158_v12 = vadd.f32 %v191_v10, %v141_v11  ;;  %v219_v13 = vpop.f32.mrb[1].mxu0 }
 0x11c   :  { %v144_v14 = vpop.f32.mrb[2].mxu0 }
 0x11d   :  { %159 = vst [vmem:[#allocation7] sm:$0xff] %v158_v12  ;;  %v220_v15 = vpop.f32.mrb[3].mxu0 }
 0x11e   :  { %291 = shalt.err (!%p288_p6)
}
 0x11f   :  { %s292_s2 = scalar_lea.hbm %s384_s3, 128 }
 0x120   :  { %p293_p7 = scmp.ne.s32.totalorder %s384_s3, %s292_s2  ;;  %p296_p8 = scmp.lt.u32.totalorder %s292_s2, %s384_s3 }
 0x122   :  { %p298_p9 = pnand %p296_p8, %p293_p7 }
 0x124   :  { %301 = shalt.err (!%p298_p9)
}
 0x125   :  { %176 = dma.vmem_to_hbm [thread:$0]  %s174_s12, 128, %s384_s3, [#allocation4]  }
 0x126   :  { %306 = dma.done.wait [#allocation4], 128  }
 0x127   :  { %307 = vsyncadd [#allocation4], 4294967168 }
 0x128   :  { %180 = vsyncpa [#allocation3], 1 }
 0x129   :  { %181 = vsyncpa [#allocation6], 1 }
 0x12a   :  { %182 = vsyncpa [#allocation4], 1 }

</bundles_post_ra>
